<compile_context>
chip_gen: v7x
topology: tpu7x:2x2x1
jax: 0.10.0
libtpu: 0.0.40
codegen_flags: <defaults>
</compile_context>

<pallas_src>
import jax
import jax.numpy as jnp
from jax.experimental import pallas as pl
from jax.experimental.pallas import tpu as pltpu


# ---------------------------------------------------------------------------
# Tiling helper: pick a lane-dim spatial tile that (a) keeps one streamed block
# under `max_block_bytes`, (b) is a multiple of 128 (or the full extent), and
# (c) divides h*w exactly (so kernel-2 partial sums see no padding garbage).
# ---------------------------------------------------------------------------
def _choose_spatial_tile(hw, rows_per_lane, itemsize, max_block_bytes=4 << 20):
    cap = max(128, max_block_bytes // max(1, rows_per_lane * itemsize))
    if hw <= cap:
        return hw
    t = (cap // 128) * 128
    while t >= 128:
        if hw % t == 0:
            return t
        t -= 128
    return hw  # no aligned divisor; fall back to one spatial block per image


# ---------------------------------------------------------------------------
# Kernel 1: per-pixel channel-summed absolute residual  res = sum_c |x - y|.
# x, y streamed in native dtype, cast to f32 after load (matches ref upcast).
# ---------------------------------------------------------------------------
def _res_kernel(x_ref, y_ref, res_ref):
    # x_ref, y_ref: (1, c, ts)   res_ref: (1, 1, ts)
    x = x_ref[0].astype(jnp.float32)                              # (c, ts)
    y = y_ref[0].astype(jnp.float32)
    res_ref[0] = jnp.sum(jnp.abs(x - y), axis=0, keepdims=True)   # (1, ts)


def channel_abs_res(x, y, max_block_bytes=4 << 20):
    """x, y: (b, c, hw) native dtype  ->  res: (b, 1, hw) float32."""
    b, c, hw = x.shape
    ts = _choose_spatial_tile(hw, 2 * c, x.dtype.itemsize, max_block_bytes)
    n_s = hw // ts
    return pl.pallas_call(
        _res_kernel,
        out_shape=jax.ShapeDtypeStruct((b, 1, hw), jnp.float32),
        grid=(b, n_s),
        in_specs=[pl.BlockSpec((1, c, ts), lambda i, s: (i, 0, s)),
                  pl.BlockSpec((1, c, ts), lambda i, s: (i, 0, s))],
        out_specs=pl.BlockSpec((1, 1, ts), lambda i, s: (i, 0, s)),
        compiler_params=pltpu.CompilerParams(
            dimension_semantics=("parallel", "parallel")),
    )(x, y)


# ---------------------------------------------------------------------------
# Kernel 2: hard mask (res > thre) OR random mask, then masked residual sum per
# batch image.  Only res and rmask are streamed; the per-batch threshold lives
# in SMEM and is read with a scalar index.
# ---------------------------------------------------------------------------
def _masked_sum_kernel(thre_ref, res_ref, rmask_ref, psum_ref):
    i = pl.program_id(0)
    s = pl.program_id(1)

    @pl.when(s == 0)
    def _():
        psum_ref[...] = jnp.zeros_like(psum_ref)

    res = res_ref[0]                                           # (1, ts) f32
    keep = jnp.logical_or(res > thre_ref[i], rmask_ref[0] > 0.0)
    psum_ref[...] += jnp.sum(jnp.where(keep, res, 0.0))


def masked_res_sums(thre, res, rmask, max_block_bytes=4 << 20):
    """thre: (b,) f32, res: (b,1,hw) f32, rmask: (b,1,hw) f32 -> (b,) f32."""
    b, _, hw = res.shape
    ts = _choose_spatial_tile(hw, 2, 4, max_block_bytes)       # res + rmask
    n_s = hw // ts
    psum = pl.pallas_call(
        _masked_sum_kernel,
        out_shape=jax.ShapeDtypeStruct((b, 1, 128), jnp.float32),
        grid=(b, n_s),
        in_specs=[
            pl.BlockSpec(memory_space=pltpu.MemorySpace.SMEM),      # thre (b,)
            pl.BlockSpec((1, 1, ts), lambda i, s: (i, 0, s)),       # res
            pl.BlockSpec((1, 1, ts), lambda i, s: (i, 0, s)),       # rmask
        ],
        out_specs=pl.BlockSpec((1, 1, 128), lambda i, s: (i, 0, 0)),
        compiler_params=pltpu.CompilerParams(
            dimension_semantics=("parallel", "arbitrary")),
    )(thre, res, rmask)
    return psum[:, 0, 0]


# ---------------------------------------------------------------------------
# Glue (plain JAX): random mask (torch.randperm analogue) + k-th largest thresh.
# ---------------------------------------------------------------------------
def make_random_mask(key, b, h, w, random_thre_p=0.1):
    # Exactly int(random_thre_p*h*w) ones per batch at random positions,
    # mirroring torch.randperm of a {1,...,1,0,...,0} vector.
    random_ind = int(random_thre_p * h * w)
    base = jnp.concatenate([jnp.ones((random_ind,), jnp.float32),
                            jnp.zeros((h * w - random_ind,), jnp.float32)])
    keys = jax.random.split(key, b)
    rmask = jax.vmap(lambda k: jax.random.permutation(k, base))(keys)
    return rmask.reshape(b, h, w)


def hem_loss(x, y, rmask, hard_thre_p=0.5, max_block_bytes=4 << 20):
    b, c, h, w = x.shape
    hw = h * w

    # Lane-dense flattening; native dtype is passed through (cast in-kernel).
    xf = x.reshape(b, c, hw)
    yf = y.reshape(b, c, hw)
    rmask_f = rmask.reshape(b, 1, hw).astype(jnp.float32)

    # Pallas: channel-summed absolute residual.
    res = channel_abs_res(xf, yf, max_block_bytes)             # (b, 1, hw) f32

    # TODO(synk): the per-batch k-th-largest threshold (torch descending sort)
    # has no clean Pallas primitive; computed with jax.lax.top_k in plain JAX.
    hard_ind = min(int(hard_thre_p * hw), hw - 1)              # clamp p == 1.0
    thre = jax.lax.top_k(res.reshape(b, hw), hard_ind + 1)[0][:, -1]   # (b,)

    # Pallas: mask construction + masked residual partial sums.
    psums = masked_res_sums(thre, res, rmask_f, max_block_bytes)   # (b,)
    return jnp.sum(psums) / (b * c * h * w)


def hem_loss_ref(x, y, rmask, hard_thre_p=0.5):
    # Pure-JAX reference of the PyTorch forward (given the same random mask).
    x = x.astype(jnp.float32)
    y = y.astype(jnp.float32)
    b, c, h, w = x.shape
    res = jnp.sum(jnp.abs(x - y), axis=1)
    hard_ind = min(int(hard_thre_p * h * w), h * w - 1)
    thre = jnp.sort(res.reshape(b, -1), axis=1)[:, ::-1][:, hard_ind]
    hard = (res > thre[:, None, None]).astype(jnp.float32)
    mask = ((hard + rmask) > 0.0).astype(jnp.float32)[:, None, :, :]
    return jnp.mean(jnp.abs(x * mask - y * mask))


if __name__ == "__main__":
    key = jax.random.PRNGKey(0)
    kx, ky, km = jax.random.split(key, 3)
    b, c, h, w = 2, 4, 16, 16

    x = jax.random.normal(kx, (b, c, h, w), jnp.float32)
    y = jax.random.normal(ky, (b, c, h, w), jnp.float32)
    rmask = make_random_mask(km, b, h, w, random_thre_p=0.1)

    ref = hem_loss_ref(x, y, rmask, hard_thre_p=0.5)

    # Single spatial block per image (default tile cap).
    loss = hem_loss(x, y, rmask, hard_thre_p=0.5)
    jax.block_until_ready(loss)
    assert jnp.allclose(loss, ref, rtol=1e-5, atol=1e-6), (loss, ref)

    # Force the multi-block spatial path (ts=128, 2 spatial steps) so the
    # kernel-2 accumulator/init/finalize logic is exercised as well.
    loss_tiled = hem_loss(x, y, rmask, hard_thre_p=0.5, max_block_bytes=1024)
    jax.block_until_ready(loss_tiled)
    assert jnp.allclose(loss_tiled, ref, rtol=1e-5, atol=1e-6), (loss_tiled, ref)

    print("KERNEL_OK")
</pallas_src>

<mosaic_0001>
module attributes {stable_mosaic.version = 11 : i64} {
  func.func @_res_kernel(%arg0: i32, %arg1: i32, %arg2: memref<1x4x256xf32, #tpu.memory_space<vmem>>, %arg3: memref<1x4x256xf32, #tpu.memory_space<vmem>>, %arg4: memref<1x1x256xf32, #tpu.memory_space<vmem>>) attributes {dimension_semantics = [#tpu.dimension_semantics<parallel>, #tpu.dimension_semantics<parallel>], iteration_bounds = array<i64: 2, 1>, scalar_prefetch = 0 : i64, scratch_operands = 0 : i64, tpu.core_type = #tpu.core_type<tc>, window_params = [{transform_indices = @transform_0, window_bounds = array<i64: 1, 4, 256>}, {transform_indices = @transform_1, window_bounds = array<i64: 1, 4, 256>}, {transform_indices = @transform_2, window_bounds = array<i64: 1, 1, 256>}]} {
    %c0 = arith.constant 0 : index
    %c0_0 = arith.constant 0 : index
    %c0_1 = arith.constant 0 : index
    %0 = vector.load %arg2[%c0, %c0_0, %c0_1] : memref<1x4x256xf32, #tpu.memory_space<vmem>>, vector<1x4x256xf32>
    %1 = vector.shape_cast %0 : vector<1x4x256xf32> to vector<4x256xf32>
    %c0_2 = arith.constant 0 : index
    %c0_3 = arith.constant 0 : index
    %c0_4 = arith.constant 0 : index
    %2 = vector.load %arg3[%c0_2, %c0_3, %c0_4] : memref<1x4x256xf32, #tpu.memory_space<vmem>>, vector<1x4x256xf32>
    %3 = vector.shape_cast %2 : vector<1x4x256xf32> to vector<4x256xf32>
    %4 = arith.subf %1, %3 : vector<4x256xf32>
    %5 = math.absf %4 : vector<4x256xf32>
    %cst = arith.constant dense<0.000000e+00> : vector<256xf32>
    %6 = vector.multi_reduction <add>, %5, %cst [0] : vector<4x256xf32> to vector<256xf32>
    %7 = vector.shape_cast %6 : vector<256xf32> to vector<1x256xf32>
    %c0_5 = arith.constant 0 : index
    %c0_6 = arith.constant 0 : index
    %c0_7 = arith.constant 0 : index
    %8 = vector.load %arg4[%c0_5, %c0_6, %c0_7] : memref<1x1x256xf32, #tpu.memory_space<vmem>>, vector<1x1x256xf32>
    %9 = vector.shape_cast %8 : vector<1x1x256xf32> to vector<1x256xf32>
    %10 = vector.shape_cast %7 : vector<1x256xf32> to vector<1x1x256xf32>
    tpu.vector_store %arg4[%c0_5, %c0_6, %c0_7], %10 {strides = array<i32>} : memref<1x1x256xf32, #tpu.memory_space<vmem>>, vector<1x1x256xf32>,
    return
  }
  func.func @transform_0(%arg0: i32, %arg1: i32) -> (i32, i32, i32) {
    %c0_i32 = arith.constant 0 : i32
    %c0_i32_0 = arith.constant 0 : i32
    return %arg0, %c0_i32, %arg1 : i32, i32, i32
  }
  func.func @transform_1(%arg0: i32, %arg1: i32) -> (i32, i32, i32) {
    %c0_i32 = arith.constant 0 : i32
    %c0_i32_0 = arith.constant 0 : i32
    return %arg0, %c0_i32, %arg1 : i32, i32, i32
  }
  func.func @transform_2(%arg0: i32, %arg1: i32) -> (i32, i32, i32) {
    %c0_i32 = arith.constant 0 : i32
    %c0_i32_0 = arith.constant 0 : i32
    return %arg0, %c0_i32, %arg1 : i32, i32, i32
  }
}

</mosaic_0001>

<bundles_post_ra>
// kernel: tpu_custom_call.1
= control target key start
LH: loop header
LB: loop body
LE: loop exit
PB: predicated region body
PF: predicated region fallthrough
CT: control target
= control target key end

     0   :  { %7 = vsyncpa [#allocation3], 0  ;;  %s873_s0 = inlined_call_operand.hbm [shape: f32[2,4,256], index: 0, kind: input, shape index: {}]   ;;  %s874_s1 = inlined_call_operand.hbm [shape: f32[2,4,256], index: 1, kind: input, shape index: {}]   ;;  %s875_s2 = inlined_call_operand.hbm [shape: f32[2,1,256], index: 2, kind: output, shape index: {}]  }
   0x1   :  { %9 = vsyncpa [#allocation3 + $0x1], 0 }
   0x2   :  { %10 = vsyncpa [#allocation6], 0 }
   0x3   :  { %12 = vsyncpa [#allocation6 + $0x1], 0 }
   0x4   :  { %13 = vsyncpa [#allocation4], 0 }
   0x5   :  { %15 = vsyncpa [#allocation4 + $0x1], 0  ;;  %s652_s9 = smov 0   ;;  %s654_s10 = smov 0  }
   0x6   :  { %s656_s11 = smov 0   ;;  %s658_s12 = smov 0  }
   0x7   :  { %s660_s13 = smov 0   ;;  %s662_s14 = smov 0  }
   0x8 LB: > { %s395_s15 = sadd.s32 4294967295, %s631_s14   ;;  %s396_s16 = sadd.s32 4294967294, %s631_s14   ;;  %s631_s14 = sphi %s662_s14, %s21_s14   ;;  %s627_s13 = sphi %s660_s13, %s895_s13   ;;  %s623_s12 = sphi %s658_s12, %s894_s12   ;;  %s619_s11 = sphi %s656_s11, %s893_s11   ;;  %s615_s10 = sphi %s654_s10, %s892_s10   ;;  %s611_s9 = sphi %s652_s9, %s891_s9  }
   0x9   : > { %s33_s17 = sadd.s32 1, %s627_s13  ;;  %s42_s18 = sadd.s32 1, %s619_s11 }
   0xa   : > { %p35_p0 = scmp.ge.s32.totalorder %s33_s17, 2  ;;  %p49_p1 = scmp.ne.s32.totalorder %s619_s11, %s615_s10 }
   0xb   : > { %p50_p2 = scmp.eq.s32.totalorder %s631_s14, 0  ;;  %p55_p3 = scmp.ne.s32.totalorder %s615_s10, %s611_s9 }
   0xc   : > { %s897_s17 = smov (%p35_p0, %s33_s17), 0  ;;  %p56_p5 = scmp.eq.s32.totalorder %s395_s15, 0 }
   0xd   : > { %p693_p4 = por %p50_p2, %p49_p1  ;;  %s37_s20 = ssub.s32 %s627_s13, %s897_s17 }
   0xe   : > { %p109_p6 = scmp.eq.s32.totalorder %s395_s15, 1  ;;  %p40_p7 = scmp.eq.s32.totalorder %s37_s20, 0 }
   0xf   : > { %p699_p8 = por %p56_p5, %p55_p3  ;;  %p115_p10 = scmp.eq.s32.totalorder %s396_s16, 1 }
  0x10   : > { %p703_p9 = por %p109_p6, %p49_p1  ;;  %p434_p13 = scmp.lt.s32.totalorder %s631_s14, 2 }
  0x11   : > { %s879_s21 = scalar_select %p699_p8, 1, 0 }
  0x12   : > { %s880_s22 = scalar_select %p703_p9, 1, 0 }
  0x13   : > { %s708_s23 = scalar_select %p40_p7, %s619_s11, %s42_s18  }
  0x14   : > { %p710_p11 = por %p115_p10, %p55_p3  ;;  %s717_s25 = sand.u32 1, %s619_s11  }
  0x15   : > { %s399_s26 = sshll.u32 %s717_s25, 3  ;;  %s414_s27 = sshll.u32 %s627_s13, 7 }
  0x16   : > { %s881_s24 = scalar_select %p710_p11, 1, 0 }
  0x17   : > { %s726_s30 = scalar_lea.hbm %s873_s0, %s414_s27  ;;  %s139_s3 = scalar_lea.vmem [#allocation2], %s399_s26 }
  0x18   : > { %s149_s4 = sshll.u32 %s139_s3, 4  ;;  %p734_p0 = pnand %p434_p13, %p693_p4  ;;  %s730_s4 = int_to_ptr.vmem [resolvable:$true] %s149_s4 }
  0x19   : > { %s136_s6 = scalar_lea.sflag [#allocation3], %s717_s25  ;;  %s485_s7 = scalar_lea.hbm %s726_s30, 128 }
  0x1a   : > { %p486_p3 = scmp.ne.s32.totalorder %s726_s30, %s485_s7  ;;  %p487_p5 = pneg %p734_p0 }
  0x1b   : > { %s490_s16 = scalar_lea.hbm %s873_s0, 256  ;;  %p491_p4 = scmp.lt.u32.totalorder %s726_s30, %s873_s0 }
  0x1c   : > { %p488_p6 = pnand %p487_p5, %p486_p3  ;;  %p492_p10 = scmp.lt.u32.totalorder %s490_s16, %s485_s7 }
  0x1d   : > { %p494_p12 = scmp.lt.u32.totalorder %s485_s7, %s726_s30 }
  0x1e   : > { %p489_p7 = pneg %p488_p6  ;;  %p493_p13 = por %p492_p10, %p491_p4 }
  0x20   : > { %p495_p1 = por %p494_p12, %p493_p13 }
  0x22   : > { %p496_p2 = pnand %p495_p1, %p489_p7 }
  0x24   : > { %499 = shalt.err (!%p496_p2)
}
  0x25   : > { %s500_s20 = scalar_lea.vmem %s730_s4, 128  ;;  %s633_s28 = smov [#allocation2]  }
  0x26   : > { %p501_p3 = scmp.ne.s32.totalorder %s730_s4, %s500_s20  ;;  %s505_s29 = sshll.u32 %s633_s28, 4  ;;  %s506_s29 = int_to_ptr.vmem [resolvable:$false] %s505_s29 }
  0x27   : > { %s507_s3 = scalar_lea.vmem %s506_s29, 256  ;;  %p508_p9 = scmp.lt.s32.totalorder %s730_s4, %s506_s29 }
  0x28   : > { %p503_p6 = pnand %p501_p3, %p487_p5  ;;  %p509_p4 = scmp.lt.s32.totalorder %s507_s3, %s500_s20 }
  0x2a   : > { %p504_p11 = pneg %p503_p6  ;;  %p510_p10 = por %p509_p4, %p508_p9 }
  0x2c   : > { %p511_p12 = pnand %p510_p10, %p504_p11 }
  0x2e   : > { %514 = shalt.err (!%p511_p12)
}
  0x2f   : > { %426 = dma.hbm_to_vmem [thread:$0]  (!%p734_p0), %s726_s30, 128, %s730_s4, %s136_s6  }
  0x30   : > { %p883_p1 = scmp.lt.s32.totalorder %s631_s14, 3  ;;  %p884_p2 = scmp.ge.s32.totalorder %s631_s14, 1 }
  0x31   : > { %s779_s16 = scalar_lea.hbm %s874_s1, %s414_s27  ;;  %s160_s18 = scalar_lea.vmem [#allocation5], %s399_s26 }
  0x32   : > { %p770_p7 = pnand %p884_p2, %p883_p1  ;;  %s170_s19 = sshll.u32 %s160_s18, 4  ;;  %s171_s19 = int_to_ptr.vmem [resolvable:$true] %s170_s19 }
  0x33   : > { %s157_s30 = scalar_lea.sflag [#allocation6], %s717_s25  ;;  %s515_s4 = scalar_lea.hbm %s779_s16, 128 }
  0x34   : > { %s885_s7 = scalar_select %p770_p7, 1, 0 }
  0x35   : > { %p516_p9 = scmp.ne.s32.totalorder %s779_s16, %s515_s4  ;;  %s520_s27 = scalar_lea.hbm %s874_s1, 256 }
  0x36   : > { %p521_p3 = scmp.lt.u32.totalorder %s779_s16, %s874_s1  ;;  %p522_p6 = scmp.lt.u32.totalorder %s520_s27, %s515_s4 }
  0x37   : > { %p518_p11 = pnand %p516_p9, %p487_p5  ;;  %p524_p10 = scmp.lt.u32.totalorder %s515_s4, %s779_s16 }
  0x38   : > { %p523_p4 = por %p522_p6, %p521_p3 }
  0x39   : > { %p519_p13 = pneg %p518_p11 }
  0x3a   : > { %p525_p12 = por %p524_p10, %p523_p4 }
  0x3c   : > { %p526_p1 = pnand %p525_p12, %p519_p13 }
  0x3e   : > { %529 = shalt.err (!%p526_p1)
}
  0x3f   : > { %s530_s25 = scalar_lea.vmem %s171_s19, 128  ;;  %s634_s26 = smov [#allocation5]  }
  0x40   : > { %p531_p2 = scmp.ne.s32.totalorder %s171_s19, %s530_s25  ;;  %s535_s3 = sshll.u32 %s634_s26, 4  ;;  %s536_s3 = int_to_ptr.vmem [resolvable:$false] %s535_s3 }
  0x41   : > { %s537_s8 = scalar_lea.vmem %s536_s3, 256  ;;  %p538_p8 = scmp.lt.s32.totalorder %s171_s19, %s536_s3 }
  0x42   : > { %p533_p9 = pnand %p531_p2, %p487_p5  ;;  %p539_p7 = scmp.lt.s32.totalorder %s537_s8, %s530_s25 }
  0x44   : > { %p534_p11 = pneg %p533_p9  ;;  %p540_p3 = por %p539_p7, %p538_p8 }
  0x46   : > { %p541_p6 = pnand %p540_p3, %p534_p11 }
  0x48   : > { %544 = shalt.err (!%p541_p6)
}
  0x49   : > { %429 = dma.hbm_to_vmem [thread:$0]  (!%p734_p0), %s779_s16, 128, %s171_s19, %s157_s30  }
  0x4a   : > { %p886_p13 = scmp.ne.s32.totalorder %s885_s7, 0 }
  0x4b   : > { %s806_s15 = sand.u32 (!%p886_p13), 1, %s615_s10   ;;  %p887_p5 = scmp.ne.s32.totalorder (!%p886_p13), %s879_s21, 0 }
  0x4c   : > { %179 = sbr.rel (%p886_p13) target bundleno = 126 (0x7e), region = 28  ;;  %s406_s18 = sshll.u32 (!%p886_p13), %s806_s15, 3 }
  0x4d   : > { %s182_s4 = scalar_lea.sflag (!%p886_p13), [#allocation3], %s806_s15  ;;  %s185_s6 = scalar_lea.vmem (!%p886_p13), [#allocation2], %s406_s18 }
  0x53   : > { %598 = dma.done.wait (%p887_p5), %s182_s4, 128  }
  0x54   : > { %600 = vsyncadd (%p887_p5), %s182_s4, 4294967168  ;;  %s191_s5 = scalar_lea.sflag [#allocation6], %s806_s15  ;;  %s194_s16 = scalar_lea.vmem [#allocation5], %s406_s18 }
  0x55   : > { %602 = dma.done.wait (%p887_p5), %s191_s5, 128  }
  0x56   : > { %604 = vsyncadd (%p887_p5), %s191_s5, 4294967168  ;;  %v223_v0 = vld [vmem:[%s185_s6] sm:$0xff]  ;;  %v224_v1 = vld [vmem:[%s194_s16] sm:$0xff]  ;;  %vm230_vm0 = vcmask 1043456   ;;  %v635_v12 = vmov 1966171168   ;;  %v251_v14 = vlaneseq }
  0x57   : > { %v225_v2 = vsub.f32 %v223_v0, %v224_v1  ;;  %v249_v13 = vunpack.c.l.s4 %v635_v12  ;;  %s408_s21 = sshll.u32 %s806_s15, 1  ;;  %s416_s30 = sshll.u32 %s623_s12, 5 }
  0x58   : > { %v252_v20 = vshrl.u32 %v251_v14, 7  ;;  %s219_s7 = scalar_lea.vmem [#allocation7], %s408_s21  ;;  %vm265_vm1 = vcmp.lt.s32.totalorder %v251_v14, 256  ;;  %s826_s28 = scalar_lea.hbm %s875_s2, %s416_s30 }
  0x59   : > { %v226_v3 = vand.u32 2147483647, %v225_v2  ;;  %v250_v19 = vunpack.c.0.s8 %v249_v13  ;;  %s285_s19 = sshll.u32 %s219_s7, 4  ;;  %s269_s29 = scalar_lea.sflag [#allocation4], %s806_s15  ;;  %s821_s19 = int_to_ptr.vmem [resolvable:$true] %s285_s19 }
  0x5a   : > { %s545_s25 = scalar_lea.vmem %s821_s19, 32  ;;  %p888_p0 = scmp.ne.s32.totalorder %s880_s22, 0 }
  0x5b   : > { %v228_v4 = vcombine.high %v226_v3, %v226_v3  ;;  %v231_v5 = vsel %vm230_vm0, %v226_v3, 0.0  ;;  %v253_v24 = vsub.s32 %v250_v19, %v252_v20  ;;  %p546_p8 = scmp.ne.s32.totalorder %s821_s19, %s545_s25  ;;  %s636_s12 = smov [#allocation7]  }
  0x5c   : > { %v232_v6 = vrot.slane %v231_v5, 4  ;;  %s549_s26 = sshll.u32 %s636_s12, 4  ;;  %s550_s26 = int_to_ptr.vmem [resolvable:$false] %s549_s26 }
  0x5d   : > { %v238_v7 = vsel %vm230_vm0, %v228_v4, 0.0  ;;  %p547_p7 = pnand %p546_p8, %p888_p0  ;;  %s551_s3 = scalar_lea.vmem %s550_s26, 64 }
  0x5e   : > { %v233_v8 = vadd.f32 %v232_v6, %v231_v5  ;;  %v239_v9 = vrot.slane %v238_v7, 4  ;;  %p552_p10 = scmp.lt.s32.totalorder %s821_s19, %s550_s26  ;;  %p553_p12 = scmp.lt.s32.totalorder %s551_s3, %s545_s25 }
  0x5f   : > { %p548_p4 = pneg %p547_p7 }
  0x60   : > { %v234_v10 = vrot.slane %v233_v8, 2  ;;  %v240_v11 = vadd.f32 %v239_v9, %v238_v7  ;;  %p554_p1 = por %p553_p12, %p552_p10 }
  0x62   : > { %v235_v15 = vadd.f32 %v234_v10, %v233_v8  ;;  %v241_v16 = vrot.slane %v240_v11, 2  ;;  %p555_p2 = pnand %p554_p1, %p548_p4 }
  0x64   : > { %v236_v17 = vrot.slane %v235_v15, 1  ;;  %v242_v18 = vadd.f32 %v241_v16, %v240_v11 }
  0x66   : > { %v237_v21 = vadd.f32 %v236_v17, %v235_v15  ;;  %v243_v22 = vrot.slane %v242_v18, 1 }
  0x68   : > { %v244_v23 = vadd.f32 %v243_v22, %v242_v18 }
  0x6a   : > { %v247_v25 = vcombine.low %v237_v21, %v244_v23 }
  0x6c   : > { %v254_v26 = vrot.slane %v247_v25, %v253_v24 }
  0x6e   : > { %v261_v27 = vrot.slane %v254_v26, %v253_v24 }
  0x70   : > { %267 = vst.msk [vmem:[%s219_s7] sm:$0x3] %vm265_vm1, %v261_v27 }
  0x71   : > { %558 = shalt.err (!%p555_p2)
}
  0x72   : > { %s559_s8 = scalar_lea.hbm %s826_s28, 32  ;;  %s563_s4 = scalar_lea.hbm %s875_s2, 64 }
  0x73   : > { %p560_p9 = scmp.ne.s32.totalorder %s826_s28, %s559_s8  ;;  %p564_p6 = scmp.lt.u32.totalorder %s826_s28, %s875_s2 }
  0x74   : > { %p565_p13 = scmp.lt.u32.totalorder %s563_s4, %s559_s8  ;;  %p567_p8 = scmp.lt.u32.totalorder %s559_s8, %s826_s28 }
  0x75   : > { %p561_p11 = pnand %p560_p9, %p888_p0 }
  0x76   : > { %p566_p5 = por %p565_p13, %p564_p6 }
  0x77   : > { %p562_p3 = pneg %p561_p11 }
  0x78   : > { %p568_p7 = por %p567_p8, %p566_p5 }
  0x7a   : > { %p569_p4 = pnand %p568_p7, %p562_p3 }
  0x7c   : > { %572 = shalt.err (!%p569_p4)
}
  0x7d   : > { %421 = dma.vmem_to_hbm [thread:$0]  (%p888_p0), %s821_s19, 32, %s826_s28, %s269_s29  }
  0x7e PF: > { %s297_s16 = sand.u32 1, %s611_s9   ;;  %p889_p10 = scmp.ne.s32.totalorder %s881_s24, 0 }
  0x7f   : > { %p890_p12 = scmp.ge.s32.totalorder %s631_s14, 2  ;;  %s298_s21 = scalar_lea.sflag [#allocation4], %s297_s16 }
  0x81   : > { %p431_p1 = pnand %p890_p12, %p889_p10 }
  0x83   : > { %606 = dma.done.wait (!%p431_p1), %s298_s21, 32  }
  0x84   : > { %608 = vsyncadd (!%p431_p1), %s298_s21, 4294967264  ;;  %s21_s14 = sadd.s32 1, %s631_s14   ;;  %s891_s9 = smov %s615_s10 }
  0x85   : > { %p18_p2 = scmp.ge.s32.totalorder %s21_s14, 4   ;;  %s892_s10 = smov %s619_s11 }
  0x86   : > { %s893_s11 = smov %s708_s23  ;;  %s894_s12 = smov %s627_s13 }
  0x87   : > { %s895_s13 = smov %s897_s17  ;;  %20 = sbr.rel (!%p18_p2) target bundleno = 8 (0x8), region = 86 }
  0x8e   :  { %303 = vsyncpa [#allocation3], 1 }
  0x8f   :  { %305 = vsyncpa [#allocation3 + $0x1], 1 }
  0x90   :  { %306 = vsyncpa [#allocation6], 1 }
  0x91   :  { %308 = vsyncpa [#allocation6 + $0x1], 1 }
  0x92   :  { %309 = vsyncpa [#allocation4], 1 }
  0x93   :  { %311 = vsyncpa [#allocation4 + $0x1], 1 }

</bundles_post_ra>
